<compile_context>
chip_gen: v5e
topology: v5e:2x2
jax: 0.10.0
libtpu: 0.0.40
codegen_flags: <defaults>
</compile_context>

<pallas_src>
import jax
import jax.numpy as jnp
from jax.experimental import pallas as pl
from jax.experimental.pallas import tpu as pltpu


def _patch_embed_kernel(x_ref, w_ref, cls_ref, pos_ref, o_ref):
    """One grid step processes BT whole batch elements.

    x_ref:   (BT, N, D) bf16  patch rows (no cls padding row)
    w_ref:   (D, E)     bf16  projection weight, grid-invariant (resident)
    cls_ref: (1, E)     f32   cls_token + positions[0]          (resident)
    pos_ref: (N, E)     f32   positions[1:] + linear bias       (resident)
    o_ref:   (BT, T, E) out_dtype, T = N + 1
    """
    w = w_ref[...]
    pos = pos_ref[...]
    cls_row = cls_ref[...].astype(o_ref.dtype)          # (1, E)
    bt = o_ref.shape[0]
    n = pos_ref.shape[0]
    # Static unroll over the (small) number of batch elements in this step;
    # all BT matmuls happen inside ONE grid step, so the ~0.35us per-step
    # pipeline overhead is still amortized over BT*T token rows.
    for b in range(bt):
        # cls token row comes straight from the resident table — no zero-row
        # flows through the MXU and no output-side concatenate is needed.
        o_ref[b, pl.ds(0, 1), :] = cls_row
        y = jnp.dot(x_ref[b], w, preferred_element_type=jnp.float32)    # (N, E)
        o_ref[b, pl.ds(1, n), :] = (y + pos).astype(o_ref.dtype)


def _choose_batch_tile(B, T, max_rows_per_step):
    """Whole batch elements per grid step.

    No divisibility requirement on B (the grid uses cdiv and the ragged last
    block is masked).  BT is capped at ceil(B/2) so the grid has >= 2 steps,
    letting the pipeline overlap prefetch/writeback and letting v7x's two
    TensorCores split the 'parallel' axis.
    """
    bt = max(1, max_rows_per_step // T)
    if B >= 2:
        bt = min(bt, (B + 1) // 2)
    return max(1, min(bt, B))


def patch_embedding_forward(x, w, b, cls_token, positions, patch_size,
                            *, out_dtype=None, max_rows_per_step=1024):
    """x: (B, C, H, W) float32 (NCHW, same as PyTorch).

    w:         (patch_size*patch_size*C, E)  -- torch Linear weight transposed
    b:         (E,)
    cls_token: (1, 1, E)
    positions: (N_patches + 1, E)
    out_dtype: output dtype; default x.dtype (f32).  Use jnp.bfloat16 on
               HBM-bound v6e/v7x deployments.
    max_rows_per_step: token rows per grid step (~1024 for v5e/v6e, ~2048 v7x).
    returns:   (B, N_patches + 1, E)
    """
    B, C, H, W = x.shape
    P = patch_size
    h, w_ = H // P, W // P
    N = h * w_
    D = P * P * C
    E = w.shape[1]
    T = N + 1
    out_dtype = jnp.dtype(x.dtype if out_dtype is None else out_dtype)

    # --- prologue: NCHW -> (B, N, D) patch rows in bf16 (one transpose/cast
    # pass, no zero-row concatenate).
    patches = x.reshape(B, C, h, P, w_, P)
    patches = jnp.transpose(patches, (0, 2, 4, 3, 5, 1)).reshape(B, N, D)
    x_p = patches.astype(jnp.bfloat16)

    # Tiny resident additive tables: fold Linear bias and cls token in.
    cls_row = (cls_token[0, 0] + positions[0]).reshape(1, E).astype(jnp.float32)
    pos_patch = (positions[1:] + b[None, :]).astype(jnp.float32)        # (N, E)

    w_bf16 = w.astype(jnp.bfloat16)

    BT = _choose_batch_tile(B, T, max_rows_per_step)
    grid = (pl.cdiv(B, BT),)          # decoupled from B's divisors

    out_bytes = out_dtype.itemsize
    # x and out are double-buffered by the pipeline; count the invariant
    # weight / tables twice to be safe.  Clamp into [32, 48] MiB: large enough
    # that v5e's 16 MiB scoped default never binds at production shapes, small
    # enough for v7x's 64 MiB physical VMEM.
    est = (2 * BT * N * D * 2 + 2 * BT * T * E * out_bytes
           + 2 * D * E * 2 + 2 * (T * E * 4))
    vmem_limit = int(min(48 << 20, max(32 << 20, 2 * est)))

    cost = pl.CostEstimate(
        flops=2 * B * N * D * E,
        transcendentals=0,
        bytes_accessed=(x_p.size * 2 + w_bf16.size * 2
                        + (cls_row.size + pos_patch.size) * 4
                        + B * T * E * out_bytes),
    )

    out = pl.pallas_call(
        _patch_embed_kernel,
        out_shape=jax.ShapeDtypeStruct((B, T, E), out_dtype),
        grid_spec=pltpu.PrefetchScalarGridSpec(
            num_scalar_prefetch=0,
            grid=grid,
            in_specs=[
                pl.BlockSpec((BT, N, D), lambda i: (i, 0, 0)),
                pl.BlockSpec((D, E), lambda i: (0, 0)),   # invariant -> resident
                pl.BlockSpec((1, E), lambda i: (0, 0)),   # invariant -> resident
                pl.BlockSpec((N, E), lambda i: (0, 0)),   # invariant -> resident
            ],
            out_specs=pl.BlockSpec((BT, T, E), lambda i: (i, 0, 0)),
        ),
        compiler_params=pltpu.CompilerParams(
            dimension_semantics=("parallel",),   # grid >= 2 -> both v7x TCs work
            vmem_limit_bytes=vmem_limit,
        ),
        cost_estimate=cost,
    )(x_p, w_bf16, cls_row, pos_patch)

    return out


if __name__ == "__main__":
    # Small shapes consistent with the module: channel_input=4, patch_size=4,
    # embedding_dim=32, img_size=16  ->  N_patches = 16, patch_dim = 64.
    B, C, IMG, P, E = 2, 4, 16, 4, 32
    N = (IMG // P) ** 2
    D = P * P * C

    key = jax.random.PRNGKey(0)
    kx, kw, kb, kc, kp = jax.random.split(key, 5)

    x = jax.random.normal(kx, (B, C, IMG, IMG), dtype=jnp.float32)
    # nn.Linear weight is (E, D) in torch; store transposed (D, E) for the kernel.
    w = (jax.random.normal(kw, (E, D), dtype=jnp.float32) * 0.02).T
    b = jax.random.normal(kb, (E,), dtype=jnp.float32) * 0.02
    cls_token = jax.random.normal(kc, (1, 1, E), dtype=jnp.float32)
    positions = jax.random.normal(kp, (N + 1, E), dtype=jnp.float32)

    out = patch_embedding_forward(x, w, b, cls_token, positions, P)
    out = jax.block_until_ready(out)

    # Pure-JAX f32 reference of the module's semantics (kernel matmul is bf16
    # with f32 accumulation, hence the loose-ish tolerance).
    patches = x.reshape(B, C, IMG // P, P, IMG // P, P)
    patches = jnp.transpose(patches, (0, 2, 4, 3, 5, 1)).reshape(B, N, D)
    ref_patch = patches @ w + b
    ref = jnp.concatenate(
        [jnp.broadcast_to(cls_token, (B, 1, E)), ref_patch], axis=1
    ) + positions[None, :, :]

    assert out.shape == (B, N + 1, E)
    err = float(jnp.max(jnp.abs(out - ref)))
    assert jnp.allclose(out, ref, atol=1e-2, rtol=1e-2), err
    print("KERNEL_OK")
</pallas_src>

<mosaic_0001>
module attributes {stable_mosaic.version = 11 : i64} {
  func.func @_patch_embed_kernel(%arg0: i32, %arg1: memref<1x16x64xbf16, #tpu.memory_space<vmem>>, %arg2: memref<64x32xbf16, #tpu.memory_space<vmem>>, %arg3: memref<1x32xf32, #tpu.memory_space<vmem>>, %arg4: memref<16x32xf32, #tpu.memory_space<vmem>>, %arg5: memref<1x17x32xf32, #tpu.memory_space<vmem>>) attributes {dimension_semantics = [#tpu.dimension_semantics<parallel>], iteration_bounds = array<i64: 2>, scalar_prefetch = 0 : i64, scratch_operands = 0 : i64, tpu.core_type = #tpu.core_type<tc>, window_params = [{transform_indices = @transform_0, window_bounds = array<i64: 1, 16, 64>}, {pipeline_mode = #tpu.pipeline_mode<synchronous>, transform_indices = @transform_1, window_bounds = array<i64: 64, 32>}, {pipeline_mode = #tpu.pipeline_mode<synchronous>, transform_indices = @transform_2, window_bounds = array<i64: 1, 32>}, {pipeline_mode = #tpu.pipeline_mode<synchronous>, transform_indices = @transform_3, window_bounds = array<i64: 16, 32>}, {transform_indices = @transform_4, window_bounds = array<i64: 1, 17, 32>}]} {
    %c0 = arith.constant 0 : index
    %c0_0 = arith.constant 0 : index
    %0 = vector.load %arg2[%c0, %c0_0] : memref<64x32xbf16, #tpu.memory_space<vmem>>, vector<64x32xbf16>
    %c0_1 = arith.constant 0 : index
    %c0_2 = arith.constant 0 : index
    %1 = vector.load %arg4[%c0_1, %c0_2] : memref<16x32xf32, #tpu.memory_space<vmem>>, vector<16x32xf32>
    %c0_3 = arith.constant 0 : index
    %c0_4 = arith.constant 0 : index
    %2 = vector.load %arg3[%c0_3, %c0_4] : memref<1x32xf32, #tpu.memory_space<vmem>>, vector<1x32xf32>
    %c0_5 = arith.constant 0 : index
    %c0_6 = arith.constant 0 : index
    %c0_7 = arith.constant 0 : index
    %3 = vector.load %arg5[%c0_5, %c0_6, %c0_7] : memref<1x17x32xf32, #tpu.memory_space<vmem>>, vector<1x1x32xf32>
    %4 = vector.shape_cast %3 : vector<1x1x32xf32> to vector<1x32xf32>
    %5 = vector.shape_cast %2 : vector<1x32xf32> to vector<1x1x32xf32>
    tpu.vector_store %arg5[%c0_5, %c0_6, %c0_7], %5 {strides = array<i32>} : memref<1x17x32xf32, #tpu.memory_space<vmem>>, vector<1x1x32xf32>,
    %c0_8 = arith.constant 0 : index
    %c0_9 = arith.constant 0 : index
    %c0_10 = arith.constant 0 : index
    %6 = vector.load %arg1[%c0_8, %c0_9, %c0_10] : memref<1x16x64xbf16, #tpu.memory_space<vmem>>, vector<1x16x64xbf16>
    %7 = vector.shape_cast %6 : vector<1x16x64xbf16> to vector<16x64xbf16>
    %cst = arith.constant dense<0.000000e+00> : vector<16x32xf32>
    %8 = tpu.matmul %7, %0, %cst {dimension_numbers = #tpu.dot_dimension_numbers<[1], [0], [0], [1], [0, 0, 1, 1], [], []>} : vector<16x64xbf16>, vector<64x32xbf16>, vector<16x32xf32> -> vector<16x32xf32>
    %9 = arith.addf %8, %1 : vector<16x32xf32>
    %c0_11 = arith.constant 0 : index
    %c1 = arith.constant 1 : index
    %c0_12 = arith.constant 0 : index
    %10 = vector.load %arg5[%c0_11, %c1, %c0_12] : memref<1x17x32xf32, #tpu.memory_space<vmem>>, vector<1x16x32xf32>
    %11 = vector.shape_cast %10 : vector<1x16x32xf32> to vector<16x32xf32>
    %12 = vector.shape_cast %9 : vector<16x32xf32> to vector<1x16x32xf32>
    tpu.vector_store %arg5[%c0_11, %c1, %c0_12], %12 {strides = array<i32>} : memref<1x17x32xf32, #tpu.memory_space<vmem>>, vector<1x16x32xf32>,
    return
  }
  func.func @transform_0(%arg0: i32) -> (i32, i32, i32) {
    %c0_i32 = arith.constant 0 : i32
    %c0_i32_0 = arith.constant 0 : i32
    %c0_i32_1 = arith.constant 0 : i32
    return %arg0, %c0_i32, %c0_i32_0 : i32, i32, i32
  }
  func.func @transform_1(%arg0: i32) -> (i32, i32) {
    %c0_i32 = arith.constant 0 : i32
    %c0_i32_0 = arith.constant 0 : i32
    %c0_i32_1 = arith.constant 0 : i32
    return %c0_i32, %c0_i32_0 : i32, i32
  }
  func.func @transform_2(%arg0: i32) -> (i32, i32) {
    %c0_i32 = arith.constant 0 : i32
    %c0_i32_0 = arith.constant 0 : i32
    %c0_i32_1 = arith.constant 0 : i32
    return %c0_i32, %c0_i32_0 : i32, i32
  }
  func.func @transform_3(%arg0: i32) -> (i32, i32) {
    %c0_i32 = arith.constant 0 : i32
    %c0_i32_0 = arith.constant 0 : i32
    %c0_i32_1 = arith.constant 0 : i32
    return %c0_i32, %c0_i32_0 : i32, i32
  }
  func.func @transform_4(%arg0: i32) -> (i32, i32, i32) {
    %c0_i32 = arith.constant 0 : i32
    %c0_i32_0 = arith.constant 0 : i32
    %c0_i32_1 = arith.constant 0 : i32
    return %arg0, %c0_i32, %c0_i32_0 : i32, i32, i32
  }
}

</mosaic_0001>

<bundles_post_ra>
// kernel: tpu_custom_call.1
= control target key start
LH: loop header
LB: loop body
LE: loop exit
PB: predicated region body
PF: predicated region fallthrough
CT: control target
= control target key end

     0   :  { %s398_s15 = smov 0   ;;  %s436_s0 = inlined_call_operand.vmem [shape: bf16[2,16,64], index: 0, kind: input, shape index: {}]   ;;  %s437_s1 = inlined_call_operand.vmem [shape: bf16[64,32], index: 1, kind: input, shape index: {}]   ;;  %s438_s2 = inlined_call_operand.vmem [shape: f32[1,32], index: 2, kind: input, shape index: {}]   ;;  %s439_s3 = inlined_call_operand.vmem [shape: f32[16,32], index: 3, kind: input, shape index: {}]   ;;  %s440_s4 = inlined_call_operand.vmem [shape: f32[2,17,32], index: 4, kind: output, shape index: {}]  }
   0x1 LB: > { %s319_s16 = sadd.s32 4294967295, %s371_s15   ;;  %p323_p0 = scmp.ge.s32.totalorder %s371_s15, 1  ;;  %s371_s15 = sphi %s398_s15, %s14_s15  }
   0x2   : > { %p162_p1 = scmp.lt.s32.totalorder %s371_s15, 3 }
   0x4   : > { %p163_p2 = pnand %p323_p0, %p162_p1 }
   0x5   : > { %p188_p3 = scmp.lt.s32.totalorder (!%p163_p2), %s319_s16, 1 }
   0x6   : > { %166 = sbr.rel (%p163_p2) target bundleno = 164 (0xa4), region = 36 }
   0xb   : > { %v354_v0 = vld [vmem:[%s437_s1 + $0x18] sm:$0xff]  ;;  %v353_v1 = vld [vmem:[%s437_s1 + $0x10] sm:$0xff]  ;;  %s442_s16 = smov (!%p188_p3, %s319_s16), 1  ;;  %v209_v2 = vld [vmem:[%s438_s2] sm:$0x1]  ;;  %vm210_vm0 = vcmask 253952  }
   0xc   : > { %251 = vmatpush.bf16.msra.mxu0 %v354_v0  ;;  %s356_s21 = smul.u32 24, %s442_s16  ;;  %v352_v3 = vld [vmem:[%s437_s1 + $0x8] sm:$0xff]  ;;  %s350_s29 = sshll.u32 %s442_s16, 3  ;;  %v351_v4 = vld [vmem:[%s437_s1] sm:$0xff]  ;;  %vm243_vm1 = vcmask 523264   ;;  %vm261_vm2 = vcmask 261120  }
   0xd   : > { %s192_s8 = scalar_lea.vmem %s436_s0, %s350_s29  ;;  %v207_v6 = vld [vmem:[%s439_s3] sm:$0xff]  ;;  %v208_v9 = vld [vmem:[%s439_s3 + $0x8] sm:$0xff] }
   0xe   : > { %s197_s28 = scalar_lea.vmem %s440_s4, %s356_s21  ;;  %v355_v5 = vld [vmem:[%s192_s8] sm:$0xff] }
   0xf   : > { %211 = vst.msk [vmem:[%s197_s28] sm:$0x1] %vm210_vm0, %v209_v2 }
  0x10   : > { %252 = vmatpush.bf16.msra.mxu0 %v353_v1 }
  0x14   : > { %253 = vmatpush.bf16.msra.mxu0 %v352_v3 }
  0x18   : > { %254 = vmatpush.bf16.msra.mxu0 %v351_v4 }
  0x1b   : > { %347 = vmatmul.msk.bf16.vlgmr.msra.gmra.mxu0 %vm243_vm1, %v355_v5 }
  0x98   : > { %v256_v7 = vpop.f32.mrf.mxu0 }
  0x99   : > { %v257_v8 = vadd.f32 %v256_v7, %v207_v6 }
  0x9b   : > { %262 = vst.msk [vmem:[%s197_s28 + $0x1] sm:$0xff] %vm261_vm2, %v257_v8 }
  0xa0   : > { %v258_v10 = vpop.f32.mrf.mxu0 }
  0xa1   : > { %v259_v11 = vadd.f32 %v258_v10, %v208_v9 }
  0xa3   : > { %263 = vst.msk [vmem:[%s197_s28 + $0x9] sm:$0xff] %vm261_vm2, %v259_v11 }
  0xa4 PF: > { %s14_s15 = sadd.s32 1, %s371_s15  }
  0xa5   : > { %p11_p4 = scmp.ge.s32.totalorder %s14_s15, 4  }
  0xa7   :  { %13 = sbr.rel (!%p11_p4) target bundleno = 1 (0x1), region = 66 }

</bundles_post_ra>
